<compile_context>
chip_gen: v7x
topology: tpu7x:2x2x1
jax: 0.10.0
libtpu: 0.0.40
codegen_flags: <defaults>
</compile_context>

<pallas_src>
import functools

import jax
import jax.numpy as jnp
from jax import lax
from jax.experimental import pallas as pl
from jax.experimental.pallas import tpu as pltpu

INPUT_SIZE = 128   # fc1 input size; u_t_model consumes each 64-wide half
HIDDEN = 64        # fc1 / LSTM hidden size
UT_HIDDEN = 64     # hidden size of the synthesized u_t dense model
FUSED1 = 2 * UT_HIDDEN + HIDDEN          # 192: [ut half a | ut half b | fc1]
GATES = 4 * HIDDEN                       # 256: [i | f | o | g]


# --------------------------------------------------------------------------
# Phase 1: batched x-only work (parallel over time chunks).
# --------------------------------------------------------------------------
def _precompute_kernel(
    x_ref,                          # (TC, 128) f32
    w_first_ref, b_first_ref,       # (128, 192) bf16, (1, 192) f32
    wd_a_ref, wd_b_ref, bd_ref,     # (1, 192), (1, 192), (1, 1) f32
    w_ih_ref, b_g_ref,              # (64, 256) bf16, (1, 256) f32
    gate_x_ref, u_ref,              # outputs: (TC, 256) f32, (TC, 1) f32
):
    x = x_ref[...]
    # fused first layer: [ut_a_hidden | ut_b_hidden | fc1_hidden], ReLU
    h192 = jnp.maximum(
        jnp.dot(x.astype(jnp.bfloat16), w_first_ref[...],
                preferred_element_type=jnp.float32) + b_first_ref[...],
        0.0)                                                      # (TC, 192)

    # u_t heads: VPU multiply + lane reduce; exact softmax(.)[:, 1]
    da = jnp.sum(h192 * wd_a_ref[...], axis=-1, keepdims=True)    # (TC, 1)
    db = jnp.sum(h192 * wd_b_ref[...], axis=-1, keepdims=True)    # (TC, 1)
    u_ref[...] = jax.nn.sigmoid(jnp.minimum(da, db) + bd_ref[...])

    # input->hidden gate contribution for all 4 gates (Dropout = identity)
    h_fc1 = h192[:, 2 * UT_HIDDEN:]                               # (TC, 64)
    gate_x_ref[...] = (
        jnp.dot(h_fc1.astype(jnp.bfloat16), w_ih_ref[...],
                preferred_element_type=jnp.float32) + b_g_ref[...])


# --------------------------------------------------------------------------
# Phase 2: serial recurrence over time chunks, inner fori_loop per chunk.
# --------------------------------------------------------------------------
@functools.lru_cache(maxsize=None)
def _make_recurrent_kernel(t_total, tc, unroll):
    def kernel(
        gate_x_ref, u_ref,              # (TC, 256), (TC, 1) f32
        w_hh_ref,                       # (64, 256) f32 (recurrent path in f32)
        fc3_w_ref, fc3_b_ref,           # (1, 64), (1, 1) f32
        h0_ref, c0_ref, y0_ref, a0_ref, # initial state
        yau_ref,                        # (1, 3, TC) f32: rows [y | a | u]
        h_out_ref, c_out_ref,           # (1, 64) f32 final state (resident)
        h_sc, c_sc, y_sc, a_sc,         # carries across chunks (VMEM scratch)
    ):
        ci = pl.program_id(0)

        @pl.when(ci == 0)
        def _():
            h_sc[...] = h0_ref[...]
            c_sc[...] = c0_ref[...]
            y_sc[...] = y0_ref[...]
            a_sc[...] = a0_ref[...]

        w_hh = w_hh_ref[...]
        fc3_w = fc3_w_ref[...]
        fc3_b = fc3_b_ref[...]
        base_t = ci * tc
        lane = lax.broadcasted_iota(jnp.int32, (1, tc), 1)

        def step(t, carry):
            h, c, y, a, yrow, arow, urow = carry
            gx = gate_x_ref[pl.ds(t, 1), :]                       # (1, 256)
            u_t = u_ref[pl.ds(t, 1), :]                           # (1, 1)

            # fused LSTM gates, packed order [i | f | o | g]
            gates = gx + jnp.dot(h, w_hh, preferred_element_type=jnp.float32)
            sig = jax.nn.sigmoid(gates)                           # whole vector
            i_g = sig[:, 0:HIDDEN]
            f_g = sig[:, HIDDEN:2 * HIDDEN]
            o_g = sig[:, 2 * HIDDEN:3 * HIDDEN]
            g_g = jnp.tanh(gates[:, 3 * HIDDEN:4 * HIDDEN])

            c_new = f_g * c + i_g * g_g
            h_new = o_g * jnp.tanh(c_new)

            # fc3 as VPU multiply + cross-lane reduce; first-order-delay mixing
            a_raw = jax.nn.sigmoid(
                jnp.sum(h_new * fc3_w, axis=-1, keepdims=True) + fc3_b)
            a_new = u_t * a + (1.0 - u_t) * a_raw
            y_new = a_new * u_t + (1.0 - a_new) * y

            # freeze carries on padded (t >= T) steps
            vf = ((base_t + t) < t_total).astype(jnp.float32)
            h = h + vf * (h_new - h)
            c = c + vf * (c_new - c)
            y = y + vf * (y_new - y)
            a = a + vf * (a_new - a)

            # lane-dense output accumulation (one lane per timestep)
            m = lane == t
            yrow = jnp.where(m, y_new, yrow)
            arow = jnp.where(m, a_new, arow)
            urow = jnp.where(m, u_t, urow)
            return h, c, y, a, yrow, arow, urow

        zero_row = jnp.zeros((1, tc), jnp.float32)
        init = (h_sc[...], c_sc[...], y_sc[...], a_sc[...],
                zero_row, zero_row, zero_row)
        h, c, y, a, yrow, arow, urow = lax.fori_loop(
            0, tc, step, init, unroll=unroll)

        # carry recurrence across chunks
        h_sc[...] = h
        c_sc[...] = c
        y_sc[...] = y
        a_sc[...] = a

        # one lane-dense (1, 3, TC) store per chunk; final state once per chunk
        yau_ref[...] = jnp.concatenate([yrow, arow, urow], axis=0).reshape(1, 3, tc)
        h_out_ref[...] = h
        c_out_ref[...] = c

    return kernel


# --------------------------------------------------------------------------
# Parameters (fused / packed layouts).
# --------------------------------------------------------------------------
def init_params(key):
    ks = jax.random.split(key, 12)
    scale = 0.1

    # synthesized u_t_model: Linear(64,64) -> ReLU -> Linear(64,2)
    ut_w1 = jax.random.normal(ks[0], (64, UT_HIDDEN), jnp.float32) * scale
    ut_b1 = jax.random.normal(ks[1], (1, UT_HIDDEN), jnp.float32) * scale
    ut_w2 = jax.random.normal(ks[2], (UT_HIDDEN, 2), jnp.float32) * scale
    ut_b2 = jax.random.normal(ks[3], (1, 2), jnp.float32) * scale

    fc1_w = jax.random.normal(ks[4], (INPUT_SIZE, HIDDEN), jnp.float32) * scale
    fc1_b = jax.random.normal(ks[5], (1, HIDDEN), jnp.float32) * scale

    # fused first-layer weight: block-diagonal u_t weight + fc1, (128, 192)
    ut_block = jnp.zeros((INPUT_SIZE, 2 * UT_HIDDEN), jnp.float32)
    ut_block = ut_block.at[0:64, 0:UT_HIDDEN].set(ut_w1)
    ut_block = ut_block.at[64:128, UT_HIDDEN:2 * UT_HIDDEN].set(ut_w1)
    w_first = jnp.concatenate([ut_block, fc1_w], axis=1)            # (128,192)
    b_first = jnp.concatenate([ut_b1, ut_b1, fc1_b], axis=1)        # (1,192)

    # softmax(.)[:, 1] == sigmoid(l1 - l0): fold class diff into one vector
    wd = ut_w2[:, 1] - ut_w2[:, 0]                                  # (64,)
    wd_a = jnp.zeros((1, FUSED1), jnp.float32).at[0, 0:64].set(wd)
    wd_b = jnp.zeros((1, FUSED1), jnp.float32).at[0, 64:128].set(wd)
    bd = ut_b2[:, 1:2] - ut_b2[:, 0:1]                              # (1,1)

    # LSTM weights, gates stacked on the OUTPUT axis.  Generated in PyTorch
    # order (i,f,g,o) then packed as [i|f|o|g] so tanh covers only the last
    # 64 lanes in-kernel.
    w_ih_g = jax.random.normal(ks[6], (4, HIDDEN, HIDDEN), jnp.float32) * scale
    w_hh_g = jax.random.normal(ks[7], (4, HIDDEN, HIDDEN), jnp.float32) * scale
    b_ih = jax.random.normal(ks[8], (4, HIDDEN), jnp.float32) * scale
    b_hh = jax.random.normal(ks[9], (4, HIDDEN), jnp.float32) * scale

    perm = jnp.array([0, 1, 3, 2])                                  # i,f,o,g
    w_ih_g = w_ih_g[perm]
    w_hh_g = w_hh_g[perm]
    b_g = (b_ih + b_hh)[perm]

    w_ih_s = jnp.transpose(w_ih_g, (1, 0, 2)).reshape(HIDDEN, GATES)  # (64,256)
    w_hh_s = jnp.transpose(w_hh_g, (1, 0, 2)).reshape(HIDDEN, GATES)  # (64,256)
    b_g_s = b_g.reshape(1, GATES)                                     # (1,256)

    fc3_w = jax.random.normal(ks[10], (1, HIDDEN), jnp.float32) * scale
    fc3_b = jax.random.normal(ks[11], (1, 1), jnp.float32) * scale

    return dict(
        w_first=w_first.astype(jnp.bfloat16), b_first=b_first,
        wd_a=wd_a, wd_b=wd_b, bd=bd,
        w_ih=w_ih_s.astype(jnp.bfloat16),     # batched phase-1 matmul: bf16
        w_hh=w_hh_s,                          # recurrent path kept in f32
        b_g=b_g_s, fc3_w=fc3_w, fc3_b=fc3_b)


# --------------------------------------------------------------------------
# Forward: runs T recurrent steps of the module (batch = 1).
# --------------------------------------------------------------------------
def forward(params, xs, hidden=None, y_pre=0.0, a_pre=0.0, unroll=4):
    """xs: (T, 128).  Returns (y (T,1), hidden ((1,1,64),(1,1,64)), a (T,1), u (T,))."""
    assert xs.ndim == 2 and xs.shape[1] == INPUT_SIZE, "data shape is incorrect."
    T = int(xs.shape[0])
    TC = 128 if T >= 128 else max(8, ((T + 7) // 8) * 8)    # time-chunk size
    n_chunks = -(-T // TC)
    T_pad = n_chunks * TC

    xs_f = xs.astype(jnp.float32)
    if T_pad != T:
        xs_f = jnp.concatenate(
            [xs_f, jnp.zeros((T_pad - T, INPUT_SIZE), jnp.float32)], axis=0)

    def resident(shape):
        return pl.BlockSpec(shape, lambda *i: (0,) * len(shape))

    # -------- phase 1: batched x-only matmuls (parallel over chunks) -------
    gate_x, u_seq = pl.pallas_call(
        _precompute_kernel,
        out_shape=(jax.ShapeDtypeStruct((T_pad, GATES), jnp.float32),
                   jax.ShapeDtypeStruct((T_pad, 1), jnp.float32)),
        grid_spec=pltpu.PrefetchScalarGridSpec(
            num_scalar_prefetch=0,
            grid=(n_chunks,),
            in_specs=[
                pl.BlockSpec((TC, INPUT_SIZE), lambda i: (i, 0)),   # x chunk
                resident((INPUT_SIZE, FUSED1)),                     # w_first
                resident((1, FUSED1)),                              # b_first
                resident((1, FUSED1)),                              # wd_a
                resident((1, FUSED1)),                              # wd_b
                resident((1, 1)),                                   # bd
                resident((HIDDEN, GATES)),                          # w_ih
                resident((1, GATES)),                               # b_g
            ],
            out_specs=[
                pl.BlockSpec((TC, GATES), lambda i: (i, 0)),        # gate_x
                pl.BlockSpec((TC, 1), lambda i: (i, 0)),            # u
            ],
        ),
        compiler_params=pltpu.CompilerParams(
            dimension_semantics=("parallel",)),
    )(xs_f, params['w_first'], params['b_first'], params['wd_a'],
      params['wd_b'], params['bd'], params['w_ih'], params['b_g'])

    # -------- phase 2: serial recurrence over chunks ------------------------
    if hidden is None:
        h0 = jnp.zeros((1, HIDDEN), jnp.float32)          # reset_state()
        c0 = jnp.zeros((1, HIDDEN), jnp.float32)
    else:
        h0 = jnp.reshape(hidden[0], (1, HIDDEN)).astype(jnp.float32)
        c0 = jnp.reshape(hidden[1], (1, HIDDEN)).astype(jnp.float32)
    y0 = jnp.reshape(jnp.asarray(y_pre, jnp.float32), (1, 1))
    a0 = jnp.reshape(jnp.asarray(a_pre, jnp.float32), (1, 1))

    kernel = _make_recurrent_kernel(T, TC, unroll)
    yau, h_fin, c_fin = pl.pallas_call(
        kernel,
        out_shape=(jax.ShapeDtypeStruct((n_chunks, 3, TC), jnp.float32),
                   jax.ShapeDtypeStruct((1, HIDDEN), jnp.float32),
                   jax.ShapeDtypeStruct((1, HIDDEN), jnp.float32)),
        grid_spec=pltpu.PrefetchScalarGridSpec(
            num_scalar_prefetch=0,
            grid=(n_chunks,),
            in_specs=[
                pl.BlockSpec((TC, GATES), lambda i: (i, 0)),        # gate_x
                pl.BlockSpec((TC, 1), lambda i: (i, 0)),            # u
                resident((HIDDEN, GATES)),                          # w_hh
                resident((1, HIDDEN)),                              # fc3_w
                resident((1, 1)),                                   # fc3_b
                resident((1, HIDDEN)),                              # h0
                resident((1, HIDDEN)),                              # c0
                resident((1, 1)),                                   # y0
                resident((1, 1)),                                   # a0
            ],
            out_specs=[
                pl.BlockSpec((1, 3, TC), lambda i: (i, 0, 0)),      # y/a/u rows
                resident((1, HIDDEN)),                              # h final
                resident((1, HIDDEN)),                              # c final
            ],
            scratch_shapes=[
                pltpu.VMEM((1, HIDDEN), jnp.float32),   # h carry
                pltpu.VMEM((1, HIDDEN), jnp.float32),   # c carry
                pltpu.VMEM((1, 1), jnp.float32),        # y_pre carry
                pltpu.VMEM((1, 1), jnp.float32),        # a_pre carry
            ],
        ),
        compiler_params=pltpu.CompilerParams(
            dimension_semantics=("arbitrary",)),        # recurrence: serial
    )(gate_x, u_seq, params['w_hh'], params['fc3_w'], params['fc3_b'],
      h0, c0, y0, a0)

    y_seq = yau[:, 0, :].reshape(T_pad)[:T]
    a_seq = yau[:, 1, :].reshape(T_pad)[:T]
    u_out = yau[:, 2, :].reshape(T_pad)[:T]
    hidden_out = (h_fin.reshape(1, 1, HIDDEN), c_fin.reshape(1, 1, HIDDEN))
    return (y_seq.reshape(T, 1), hidden_out, a_seq.reshape(T, 1), u_out)


if __name__ == "__main__":
    key = jax.random.PRNGKey(0)
    pkey, xkey = jax.random.split(key)
    params = init_params(pkey)

    T = 8
    xs = jax.random.normal(xkey, (T, INPUT_SIZE), dtype=jnp.float32)

    # rollout 1: hidden=None -> reset state, y_pre=a_pre=0; T steps, 2 calls
    y1, hidden, a1, u1 = forward(params, xs)
    jax.block_until_ready((y1, hidden, a1, u1))

    # rollout 2: carry hidden state and y_pre/a_pre across the call boundary
    y2, hidden2, a2, u2 = forward(params, xs, hidden=hidden,
                                  y_pre=y1[-1, 0], a_pre=a1[-1, 0])
    jax.block_until_ready((y2, hidden2, a2, u2))

    print("KERNEL_OK")
</pallas_src>

<mosaic_0001>
module attributes {stable_mosaic.version = 11 : i64} {
  func.func @_precompute_kernel(%arg0: i32, %arg1: memref<8x128xf32, #tpu.memory_space<vmem>>, %arg2: memref<128x192xbf16, #tpu.memory_space<vmem>>, %arg3: memref<1x192xf32, #tpu.memory_space<vmem>>, %arg4: memref<1x192xf32, #tpu.memory_space<vmem>>, %arg5: memref<1x192xf32, #tpu.memory_space<vmem>>, %arg6: memref<1x1xf32, #tpu.memory_space<vmem>>, %arg7: memref<64x256xbf16, #tpu.memory_space<vmem>>, %arg8: memref<1x256xf32, #tpu.memory_space<vmem>>, %arg9: memref<8x256xf32, #tpu.memory_space<vmem>>, %arg10: memref<8x1xf32, #tpu.memory_space<vmem>>) attributes {dimension_semantics = [#tpu.dimension_semantics<parallel>], iteration_bounds = array<i64: 1>, scalar_prefetch = 0 : i64, scratch_operands = 0 : i64, tpu.core_type = #tpu.core_type<tc>, window_params = [{transform_indices = @transform_0, window_bounds = array<i64: 8, 128>}, {pipeline_mode = #tpu.pipeline_mode<synchronous>, transform_indices = @transform_1, window_bounds = array<i64: 128, 192>}, {pipeline_mode = #tpu.pipeline_mode<synchronous>, transform_indices = @transform_2, window_bounds = array<i64: 1, 192>}, {pipeline_mode = #tpu.pipeline_mode<synchronous>, transform_indices = @transform_3, window_bounds = array<i64: 1, 192>}, {pipeline_mode = #tpu.pipeline_mode<synchronous>, transform_indices = @transform_4, window_bounds = array<i64: 1, 192>}, {pipeline_mode = #tpu.pipeline_mode<synchronous>, transform_indices = @transform_5, window_bounds = array<i64: 1, 1>}, {pipeline_mode = #tpu.pipeline_mode<synchronous>, transform_indices = @transform_6, window_bounds = array<i64: 64, 256>}, {pipeline_mode = #tpu.pipeline_mode<synchronous>, transform_indices = @transform_7, window_bounds = array<i64: 1, 256>}, {transform_indices = @transform_8, window_bounds = array<i64: 8, 256>}, {transform_indices = @transform_9, window_bounds = array<i64: 8, 1>}]} {
    %c0 = arith.constant 0 : index
    %c0_0 = arith.constant 0 : index
    %0 = vector.load %arg1[%c0, %c0_0] : memref<8x128xf32, #tpu.memory_space<vmem>>, vector<8x128xf32>
    %1 = arith.truncf %0 : vector<8x128xf32> to vector<8x128xbf16>
    %c0_1 = arith.constant 0 : index
    %c0_2 = arith.constant 0 : index
    %2 = vector.load %arg2[%c0_1, %c0_2] : memref<128x192xbf16, #tpu.memory_space<vmem>>, vector<128x192xbf16>
    %cst = arith.constant dense<0.000000e+00> : vector<8x192xf32>
    %3 = tpu.matmul %1, %2, %cst {dimension_numbers = #tpu.dot_dimension_numbers<[1], [0], [0], [1], [0, 0, 1, 1], [], []>} : vector<8x128xbf16>, vector<128x192xbf16>, vector<8x192xf32> -> vector<8x192xf32>
    %c0_3 = arith.constant 0 : index
    %c0_4 = arith.constant 0 : index
    %4 = vector.load %arg3[%c0_3, %c0_4] : memref<1x192xf32, #tpu.memory_space<vmem>>, vector<1x192xf32>
    %5 = vector.broadcast %4 : vector<1x192xf32> to vector<8x192xf32>
    %6 = arith.addf %3, %5 : vector<8x192xf32>
    %cst_5 = arith.constant 0.000000e+00 : f32
    %7 = vector.broadcast %cst_5 : f32 to vector<8x192xf32>
    %8 = arith.maximumf %6, %7 : vector<8x192xf32>
    %c0_6 = arith.constant 0 : index
    %c0_7 = arith.constant 0 : index
    %9 = vector.load %arg4[%c0_6, %c0_7] : memref<1x192xf32, #tpu.memory_space<vmem>>, vector<1x192xf32>
    %10 = vector.broadcast %9 : vector<1x192xf32> to vector<8x192xf32>
    %11 = arith.mulf %8, %10 : vector<8x192xf32>
    %cst_8 = arith.constant dense<0.000000e+00> : vector<8xf32>
    %12 = vector.multi_reduction <add>, %11, %cst_8 [1] : vector<8x192xf32> to vector<8xf32>
    %13 = vector.shape_cast %12 : vector<8xf32> to vector<8x1xf32>
    %c0_9 = arith.constant 0 : index
    %c0_10 = arith.constant 0 : index
    %14 = vector.load %arg5[%c0_9, %c0_10] : memref<1x192xf32, #tpu.memory_space<vmem>>, vector<1x192xf32>
    %15 = vector.broadcast %14 : vector<1x192xf32> to vector<8x192xf32>
    %16 = arith.mulf %8, %15 : vector<8x192xf32>
    %cst_11 = arith.constant dense<0.000000e+00> : vector<8xf32>
    %17 = vector.multi_reduction <add>, %16, %cst_11 [1] : vector<8x192xf32> to vector<8xf32>
    %18 = vector.shape_cast %17 : vector<8xf32> to vector<8x1xf32>
    %19 = arith.minimumf %13, %18 : vector<8x1xf32>
    %c0_12 = arith.constant 0 : index
    %c0_13 = arith.constant 0 : index
    %20 = vector.load %arg6[%c0_12, %c0_13] : memref<1x1xf32, #tpu.memory_space<vmem>>, vector<1x1xf32>
    %21 = vector.broadcast %20 : vector<1x1xf32> to vector<8x1xf32>
    %22 = arith.addf %19, %21 : vector<8x1xf32>
    %23 = arith.negf %22 : vector<8x1xf32>
    %24 = math.exp %23 : vector<8x1xf32>
    %cst_14 = arith.constant 1.000000e+00 : f32
    %25 = vector.broadcast %cst_14 : f32 to vector<8x1xf32>
    %26 = arith.addf %25, %24 : vector<8x1xf32>
    %27 = arith.divf %25, %26 : vector<8x1xf32>
    %c0_15 = arith.constant 0 : index
    %c0_16 = arith.constant 0 : index
    %28 = vector.load %arg10[%c0_15, %c0_16] : memref<8x1xf32, #tpu.memory_space<vmem>>, vector<8x1xf32>
    tpu.vector_store %arg10[%c0_15, %c0_16], %27 {strides = array<i32>} : memref<8x1xf32, #tpu.memory_space<vmem>>, vector<8x1xf32>,
    %29 = vector.extract_strided_slice %8 {offsets = [0, 128], sizes = [8, 64], strides = [1, 1]} : vector<8x192xf32> to vector<8x64xf32>
    %30 = arith.truncf %29 : vector<8x64xf32> to vector<8x64xbf16>
    %c0_17 = arith.constant 0 : index
    %c0_18 = arith.constant 0 : index
    %31 = vector.load %arg7[%c0_17, %c0_18] : memref<64x256xbf16, #tpu.memory_space<vmem>>, vector<64x256xbf16>
    %cst_19 = arith.constant dense<0.000000e+00> : vector<8x256xf32>
    %32 = tpu.matmul %30, %31, %cst_19 {dimension_numbers = #tpu.dot_dimension_numbers<[1], [0], [0], [1], [0, 0, 1, 1], [], []>} : vector<8x64xbf16>, vector<64x256xbf16>, vector<8x256xf32> -> vector<8x256xf32>
    %c0_20 = arith.constant 0 : index
    %c0_21 = arith.constant 0 : index
    %33 = vector.load %arg8[%c0_20, %c0_21] : memref<1x256xf32, #tpu.memory_space<vmem>>, vector<1x256xf32>
    %34 = vector.broadcast %33 : vector<1x256xf32> to vector<8x256xf32>
    %35 = arith.addf %32, %34 : vector<8x256xf32>
    %c0_22 = arith.constant 0 : index
    %c0_23 = arith.constant 0 : index
    %36 = vector.load %arg9[%c0_22, %c0_23] : memref<8x256xf32, #tpu.memory_space<vmem>>, vector<8x256xf32>
    tpu.vector_store %arg9[%c0_22, %c0_23], %35 {strides = array<i32>} : memref<8x256xf32, #tpu.memory_space<vmem>>, vector<8x256xf32>,
    return
  }
  func.func @transform_0(%arg0: i32) -> (i32, i32) {
    %c0_i32 = arith.constant 0 : i32
    %c0_i32_0 = arith.constant 0 : i32
    return %arg0, %c0_i32 : i32, i32
  }
  func.func @transform_1(%arg0: i32) -> (i32, i32) {
    %c0_i32 = arith.constant 0 : i32
    %c0_i32_0 = arith.constant 0 : i32
    %c0_i32_1 = arith.constant 0 : i32
    return %c0_i32, %c0_i32_0 : i32, i32
  }
  func.func @transform_2(%arg0: i32) -> (i32, i32) {
    %c0_i32 = arith.constant 0 : i32
    %c0_i32_0 = arith.constant 0 : i32
    %c0_i32_1 = arith.constant 0 : i32
    return %c0_i32, %c0_i32_0 : i32, i32
  }
  func.func @transform_3(%arg0: i32) -> (i32, i32) {
    %c0_i32 = arith.constant 0 : i32
    %c0_i32_0 = arith.constant 0 : i32
    %c0_i32_1 = arith.constant 0 : i32
    return %c0_i32, %c0_i32_0 : i32, i32
  }
  func.func @transform_4(%arg0: i32) -> (i32, i32) {
    %c0_i32 = arith.constant 0 : i32
    %c0_i32_0 = arith.constant 0 : i32
    %c0_i32_1 = arith.constant 0 : i32
    return %c0_i32, %c0_i32_0 : i32, i32
  }
  func.func @transform_5(%arg0: i32) -> (i32, i32) {
    %c0_i32 = arith.constant 0 : i32
    %c0_i32_0 = arith.constant 0 : i32
    %c0_i32_1 = arith.constant 0 : i32
    return %c0_i32, %c0_i32_0 : i32, i32
  }
  func.func @transform_6(%arg0: i32) -> (i32, i32) {
    %c0_i32 = arith.constant 0 : i32
    %c0_i32_0 = arith.constant 0 : i32
    %c0_i32_1 = arith.constant 0 : i32
    return %c0_i32, %c0_i32_0 : i32, i32
  }
  func.func @transform_7(%arg0: i32) -> (i32, i32) {
    %c0_i32 = arith.constant 0 : i32
    %c0_i32_0 = arith.constant 0 : i32
    %c0_i32_1 = arith.constant 0 : i32
    return %c0_i32, %c0_i32_0 : i32, i32
  }
  func.func @transform_8(%arg0: i32) -> (i32, i32) {
    %c0_i32 = arith.constant 0 : i32
    %c0_i32_0 = arith.constant 0 : i32
    return %arg0, %c0_i32 : i32, i32
  }
  func.func @transform_9(%arg0: i32) -> (i32, i32) {
    %c0_i32 = arith.constant 0 : i32
    %c0_i32_0 = arith.constant 0 : i32
    return %arg0, %c0_i32 : i32, i32
  }
}

</mosaic_0001>

<bundles_post_ra>
// kernel: tpu_custom_call.1
= control target key start
LH: loop header
LB: loop body
LE: loop exit
PB: predicated region body
PF: predicated region fallthrough
CT: control target
= control target key end

     0   :  { %s617_s0 = inlined_call_operand.vmem [shape: f32[8,128], index: 0, kind: input, shape index: {}]   ;;  %s618_s1 = inlined_call_operand.vmem [shape: bf16[128,192], index: 1, kind: input, shape index: {}]   ;;  %s619_s2 = inlined_call_operand.vmem [shape: f32[1,192], index: 2, kind: input, shape index: {}]   ;;  %s620_s3 = inlined_call_operand.vmem [shape: f32[1,192], index: 3, kind: input, shape index: {}]   ;;  %s621_s4 = inlined_call_operand.vmem [shape: f32[1,192], index: 4, kind: input, shape index: {}]   ;;  %s622_s5 = inlined_call_operand.<no memory space> [shape: f32[1,1], index: 5, kind: input, shape index: {}]   ;;  %s623_s6 = inlined_call_operand.vmem [shape: bf16[64,256], index: 6, kind: input, shape index: {}]   ;;  %s624_s7 = inlined_call_operand.vmem [shape: f32[1,256], index: 7, kind: input, shape index: {}]   ;;  %s625_s8 = inlined_call_operand.hbm [shape: f32[8,256], index: 8, kind: output, shape index: {0}]   ;;  %s626_s9 = inlined_call_operand.vmem [shape: f32[8,1], index: 9, kind: output, shape index: {1}]  }
   0x1   :  { %v15_v0 = vstv %s622_s5 }
   0x2   :  { %16 = vst [vmem:[#allocation2] sm:$0x1] %v15_v0 }
   0x3   :  { %v396_v1 = vld [vmem:[%s618_s1 + $0x4] ss:$8 sps:$4 sm:$0xff]   ;;  %v398_v2 = vld [vmem:[%s618_s1] ss:$8 sps:$4 sm:$0xff]   ;;  %v460_v3 = vmov 0  }
   0x4   :  { %177 = vmatprep.mubr.bf16.mxu0 %v460_v3  ;;  %338 = vmatprep.mubr.bf16.mxu1 %v460_v3  ;;  %v399_v4 = vld [vmem:[%s618_s1 + $0x14] ss:$8 sps:$4 sm:$0xff]   ;;  %v401_v5 = vld [vmem:[%s618_s1 + $0x10] ss:$8 sps:$4 sm:$0xff]   ;;  %v402_v6 = vld [vmem:[%s618_s1 + $0x24] ss:$8 sps:$4 sm:$0xff]  }
   0x5   :  { %145 = vmatprep.subr.bf16.mxu0 %v396_v1  ;;  %v404_v7 = vld [vmem:[%s618_s1 + $0x20] ss:$8 sps:$4 sm:$0xff]   ;;  %v405_v8 = vld [vmem:[%s618_s1 + $0x34] ss:$8 sps:$4 sm:$0xff]   ;;  %v407_v9 = vld [vmem:[%s618_s1 + $0x30] ss:$8 sps:$4 sm:$0xff]  }
   0x6   :  { %146 = vmatpush1.bf16.msra.mxu0 %v398_v2  ;;  %v408_v10 = vld [vmem:[%s618_s1 + $0x44] ss:$8 sps:$4 sm:$0xff]   ;;  %v422_v12 = vld [vmem:[%s623_s6] ss:$8 sps:$4 sm:$0xff]   ;;  %v423_v13 = vld [vmem:[%s623_s6 + $0x14] ss:$8 sps:$4 sm:$0xff]  }
   0x7   :  { %147 = vmatprep.subr.bf16.mxu0 %v399_v4  ;;  %v420_v11 = vld [vmem:[%s623_s6 + $0x4] ss:$8 sps:$4 sm:$0xff]   ;;  %v425_v14 = vld [vmem:[%s623_s6 + $0x10] ss:$8 sps:$4 sm:$0xff]   ;;  %v410_v15 = vld [vmem:[%s618_s1 + $0x40] ss:$8 sps:$4 sm:$0xff]  }
   0x8   :  { %306 = vmatprep.subr.bf16.mxu1 %v420_v11 }
   0x9   :  { %307 = vmatpush1.bf16.msra.mxu1 %v422_v12 }
   0xa   :  { %148 = vmatpush1.bf16.msra.mxu0 %v401_v5  ;;  %308 = vmatprep.subr.bf16.mxu1 %v423_v13 }
   0xb   :  { %149 = vmatprep.subr.bf16.mxu0 %v402_v6 }
   0xe   :  { %150 = vmatpush1.bf16.msra.mxu0 %v404_v7 }
   0xf   :  { %151 = vmatprep.subr.bf16.mxu0 %v405_v8 }
  0x12   :  { %152 = vmatpush1.bf16.msra.mxu0 %v407_v9 }
  0x13   :  { %17 = vsyncpa [#allocation4], 0  ;;  %153 = vmatprep.subr.bf16.mxu0 %v408_v10  ;;  %v411_v16 = vld [vmem:[%s618_s1 + $0x54] ss:$8 sps:$4 sm:$0xff]   ;;  %309 = vmatpush1.bf16.msra.mxu1 %v425_v14  ;;  %v413_v17 = vld [vmem:[%s618_s1 + $0x50] ss:$8 sps:$4 sm:$0xff]   ;;  %v55_v28 = vlaneseq }
  0x14   :  { %v414_v18 = vld [vmem:[%s618_s1 + $0x64] ss:$8 sps:$4 sm:$0xff]   ;;  %v416_v19 = vld [vmem:[%s618_s1 + $0x60] ss:$8 sps:$4 sm:$0xff]   ;;  %v417_v20 = vld [vmem:[%s618_s1 + $0x74] ss:$8 sps:$4 sm:$0xff]  }
  0x15   :  { %v419_v21 = vld [vmem:[%s618_s1 + $0x70] ss:$8 sps:$4 sm:$0xff]   ;;  %v35_v22 = vld [vmem:[%s617_s0] sm:$0xff]  ;;  %v429_v26 = vld [vmem:[%s623_s6 + $0x34] ss:$8 sps:$4 sm:$0xff]   ;;  %v56_v29 = vshrl.u32 %v55_v28, 7 }
  0x16   :  { %154 = vmatpush1.bf16.msra.mxu0 %v410_v15  ;;  %v36_v23 = vpack.c.bf16 %v35_v22, %v35_v22  ;;  %v426_v24 = vld [vmem:[%s623_s6 + $0x24] ss:$8 sps:$4 sm:$0xff]   ;;  %v428_v25 = vld [vmem:[%s623_s6 + $0x20] ss:$8 sps:$4 sm:$0xff]   ;;  %v431_v27 = vld [vmem:[%s623_s6 + $0x30] ss:$8 sps:$4 sm:$0xff]  }
  0x17   :  { %155 = vmatprep.subr.bf16.mxu0 %v411_v16  ;;  %310 = vmatprep.subr.bf16.mxu1 %v426_v24  ;;  %v57_v30 = vsub.s32 0, %v56_v29  ;;  %v53_v31 = vld [vmem:[%s619_s2] sm:$0x3]  ;;  %v61_v32 = vsub.s32 1, %v56_v29  ;;  %vm202_vm0 = vcmask 523264   ;;  %vm240_vm1 = vcmask 7168  }
  0x18   :  { %311 = vmatpush1.bf16.msra.mxu1 %v428_v25  ;;  %v207_v35 = vld [vmem:[%s621_s4] sm:$0x3]  ;;  %s461_s20 = smov [#allocation3]  }
  0x19   :  { %312 = vmatprep.subr.bf16.mxu1 %v429_v26  ;;  %v58_v33 = vrot.slane %v53_v31, %v57_v30  ;;  %v62_v34 = vrot.slane %v53_v31, %v61_v32  ;;  %v188_v36 = vld [vmem:[%s620_s3] sm:$0x3]  ;;  %v216_v43 = vrot.slane %v207_v35, %v61_v32  ;;  %v212_v45 = vrot.slane %v207_v35, %v57_v30  ;;  %s355_s21 = sshll.u32 %s461_s20, 4  ;;  %s356_s21 = int_to_ptr.vmem [resolvable:$true] %s355_s21 }
  0x1a   :  { %156 = vmatpush1.bf16.msra.mxu0 %v413_v17  ;;  %v197_v42 = vrot.slane %v188_v36, %v61_v32  ;;  %v193_v47 = vrot.slane %v188_v36, %v57_v30  ;;  %v383_v59 = vld [vmem:[#allocation2] ss:$0 sm:$0xff]  ;;  %s436_s22 = scalar_lea.vmem %s356_s21, 256  ;;  %p441_p1 = scmp.lt.s32.totalorder %s356_s21, %s356_s21 }
  0x1b   :  { %157 = vmatprep.subr.bf16.mxu0 %v414_v18  ;;  %v251_v3 = vld [vmem:[%s624_s7] sm:$0x3]  ;;  %p437_p0 = scmp.ne.s32.totalorder %s356_s21, %s436_s22  ;;  %p442_p2 = scmp.lt.s32.totalorder %s436_s22, %s436_s22 }
  0x1c   :  { %313 = vmatpush1.bf16.msra.mxu1 %v431_v27  ;;  %v256_v4 = vrot.slane %v251_v3, %v57_v30  ;;  %v260_v5 = vrot.slane %v251_v3, %v61_v32 }
  0x1d   :  { %p443_p3 = por %p442_p2, %p441_p1 }
  0x1e   :  { %158 = vmatpush1.bf16.msra.mxu0 %v416_v19 }
  0x1f   :  { %159 = vmatprep.subr.bf16.mxu0 %v417_v20  ;;  %p444_p4 = pnand %p443_p3, %p437_p0 }
  0x22   :  { %160 = vmatpush1.bf16.msra.mxu0 %v419_v21 }
  0x25   :  { %178 = vmatmul.mubr.bf16.vlgmr.msra.gmra.mrb[0].mxu0 %v36_v23 }
  0xf8   :  { %v179_v37 = vpop.f32.mrb[0].mxu0 }
  0xf9   :  { %v180_v38 = vadd.f32 %v179_v37, %v58_v33  ;;  %v181_v39 = vpop.f32.mrb[1].mxu0 }
  0xfa   :  { %v182_v40 = vadd.f32 %v181_v39, %v62_v34  ;;  %v183_v41 = vpop.f32.mrb[2].mxu0 }
  0xfb   :  { %v186_v44 = vmax.f32 %v180_v38, 0.0  ;;  %v184_v46 = vpop.f32.mrb[3].mxu0 }
  0xfc   :  { %v187_v48 = vmax.f32 %v182_v40, 0.0 }
  0xfd   :  { %v219_v52 = vmul.f32 %v212_v45, %v186_v44  ;;  %v200_v53 = vmul.f32 %v193_v47, %v186_v44 }
  0xfe   :  { %v242_v49 = vpack.c.bf16 %v187_v48, %v187_v48  ;;  %v201_v50 = vmul.f32 %v197_v42, %v187_v48  ;;  %v220_v51 = vmul.f32 %v216_v43, %v187_v48 }
 0x100   :  { %393 = vmatmul.mubr.msk.bf16.vlgmr.msra.gmra.mrb[0].mxu1 %vm202_vm0, %v242_v49  ;;  %v203_v54 = vsel %vm202_vm0, %v201_v50, 0.0  ;;  %v221_v55 = vsel %vm202_vm0, %v220_v51, 0.0 }
 0x101   :  { %v204_v56 = vadd.f32 %v203_v54, %v200_v53  ;;  %v222_v57 = vadd.f32 %v221_v55, %v219_v52 }
 0x103   :  { %205 = vadd.xlane.f32.xlu0 %v204_v56 }
 0x107   :  { %223 = vadd.xlane.f32.xlu0 %v222_v57 }
 0x190   :  { %v206_v58 = vpop.xlane.xlu0 %205 }
 0x194   :  { %v224_v60 = vpop.xlane.xlu0 %223 }
 0x195   :  { %v225_v61 = vmin.f32 %v206_v58, %v224_v60 }
 0x197   :  { %v233_v62 = vadd.f32 %v383_v59, %v225_v61 }
 0x199   :  { %v384_v63 = vmul.f32 -1.442695, %v233_v62 }
 0x19b   :  { %432 = vpow2.f32 %v384_v63 }
 0x1a5   :  { %v433_v0 = vpop.eup %432 }
 0x1a6   :  { %v237_v1 = vadd.f32 1.0, %v433_v0 }
 0x1a8   :  { %434 = vrcp.f32 %v237_v1 }
 0x1b2   :  { %v435_v2 = vpop.eup %434 }
 0x1b3   :  { %241 = vst.msk [vmem:[%s626_s9] sm:$0xff] %vm240_vm1, %v435_v2 }
 0x1d3   :  { %v340_v6 = vpop.f32.mrb[0].mxu1 }
 0x1d4   :  { %v341_v7 = vadd.f32 %v340_v6, %v256_v4  ;;  %v342_v8 = vpop.f32.mrb[1].mxu1 }
 0x1d5   :  { %v343_v9 = vadd.f32 %v342_v8, %v260_v5  ;;  %v344_v10 = vpop.f32.mrb[2].mxu1 }
 0x1d6   :  { %347 = vst [vmem:[#allocation3] sm:$0xff] %v341_v7  ;;  %v345_v11 = vpop.f32.mrb[3].mxu1 }
 0x1d7   :  { %348 = vst [vmem:[#allocation3 + $0x8] sm:$0xff] %v343_v9 }
 0x1d8   :  { %447 = shalt.err (!%p444_p4)
}
 0x1d9   :  { %s448_s23 = scalar_lea.hbm %s625_s8, 256 }
 0x1da   :  { %p449_p5 = scmp.ne.s32.totalorder %s625_s8, %s448_s23  ;;  %p452_p6 = scmp.lt.u32.totalorder %s448_s23, %s625_s8 }
 0x1dc   :  { %p454_p7 = pnand %p452_p6, %p449_p5 }
 0x1de   :  { %457 = shalt.err (!%p454_p7)
}
 0x1df   :  { %358 = dma.vmem_to_hbm [thread:$0]  %s356_s21, 256, %s625_s8, [#allocation4]  }
 0x1e0   :  { %458 = dma.done.wait [#allocation4], 256  }
 0x1e1   :  { %459 = vsyncadd [#allocation4], 4294967040 }
 0x1e2   :  { %366 = vsyncpa [#allocation4], 1 }

</bundles_post_ra>
